<compile_context>
chip_gen: v6e
topology: v6e:2x2x1
jax: 0.10.0
libtpu: 0.0.40
codegen_flags: <defaults>
</compile_context>

<pallas_src>
import functools

import jax
import jax.numpy as jnp
from jax.experimental import pallas as pl
from jax.experimental.pallas import tpu as pltpu  # noqa: F401  (TPU backend)


LANE = 128


def _round_up(n, m=LANE):
    return ((n + m - 1) // m) * m


# -----------------------------------------------------------------------------
# Fused Pallas kernel: the whole EDenseNet forward in one invocation
# -----------------------------------------------------------------------------
def edensenet_kernel(*refs, n_layers):
    """refs = (x, W0, b0, W1, b1, ..., W_{L-1}, b_{L-1}, out).

    x  : (B, P_in)      bf16, zero-padded on the lane axis
    Wi : (P_in, P_out)  bf16, pre-transposed effective weight (Wex - Wei@Wix).T
    bi : (1, P_out)     f32
    out: (B, P_last)    f32 (lane-dense; sliced to the true width in wrapper)
    """
    x_ref = refs[0]
    o_ref = refs[-1]
    layer_refs = refs[1:-1]

    h = x_ref[...]                                        # bf16 (B, P)
    for li in range(n_layers):
        w = layer_refs[2 * li][...]                       # bf16 (P_in, P_out)
        b = layer_refs[2 * li + 1][...]                   # f32  (1, P_out)
        z = jnp.dot(h, w, preferred_element_type=jnp.float32) + b
        if li < n_layers - 1:
            # Hidden layers: fused ReLU; keep bf16 for the next MXU pass.
            h = jnp.maximum(z, 0.0).astype(jnp.bfloat16)
        else:
            o_ref[...] = z                                # lane-dense f32 store


# -----------------------------------------------------------------------------
# Parameter folding / padding (host-side, one-time per parameter set)
# -----------------------------------------------------------------------------
def prepare_params(params, layer_names):
    """Fold each E/I layer into a padded, pre-transposed bf16 effective weight."""
    prepped = []
    for name in layer_names:
        p = params[name]
        w_eff = (p["wex"] - p["wei"] @ p["wix"]).T            # (F_in, F_out) f32
        f_in, f_out = w_eff.shape
        w_pad = jnp.zeros((_round_up(f_in), _round_up(f_out)), jnp.float32)
        w_pad = w_pad.at[:f_in, :f_out].set(w_eff).astype(jnp.bfloat16)
        b_pad = jnp.zeros((1, _round_up(f_out)), jnp.float32)
        b_pad = b_pad.at[0, :f_out].set(p["b"])
        prepped.append((w_pad, b_pad))
    return prepped


def edensenet_forward_pallas(params, x, num_layers=2):
    layer_names = [f"fc{i}" for i in range(num_layers + 1)] + ["fc_output"]
    prepped = prepare_params(params, layer_names)

    B, f_in = x.shape
    p_in = _round_up(f_in)
    out_size = params["fc_output"]["wex"].shape[0]
    p_out = _round_up(out_size)

    # Lane-dense, bf16 input (zero padding keeps the math exact).
    x_pad = jnp.zeros((B, p_in), jnp.float32).at[:, :f_in].set(x).astype(jnp.bfloat16)

    flat_args = [x_pad]
    for w, b in prepped:
        flat_args.extend((w, b))

    kernel = functools.partial(edensenet_kernel, n_layers=len(prepped))
    out = pl.pallas_call(
        kernel,
        out_shape=jax.ShapeDtypeStruct((B, p_out), jnp.float32),
        # No grid / no BlockSpecs: single invocation, whole arrays in VMEM.
    )(*flat_args)
    return out[:, :out_size]


# -----------------------------------------------------------------------------
# Deterministic parameter construction (synthetic, no checkpoint loading)
# -----------------------------------------------------------------------------
def init_ei_layer(key, n_in, n_out, ni):
    k1, k2, k3, k4 = jax.random.split(key, 4)
    # danns_eg-style non-negative E/I weights; deterministic synthetic init.
    wex = jnp.abs(jax.random.normal(k1, (n_out, n_in), jnp.float32)) / jnp.sqrt(n_in)
    wix = jnp.abs(jax.random.normal(k2, (ni, n_in), jnp.float32)) / jnp.sqrt(n_in)
    wei = jnp.abs(jax.random.normal(k3, (n_out, ni), jnp.float32)) / float(ni)
    b = 0.1 * jax.random.normal(k4, (n_out,), jnp.float32)
    return dict(wex=wex, wix=wix, wei=wei, b=b)


def init_edensenet(key, input_size, hidden_size, output_size, num_layers=2):
    ni_hidden = max(1, int(hidden_size * 0.1))
    ni_out = max(1, int(output_size * 0.1))
    keys = jax.random.split(key, num_layers + 2)
    params = {"fc0": init_ei_layer(keys[0], input_size, hidden_size, ni_hidden)}
    for i in range(num_layers):
        params[f"fc{i + 1}"] = init_ei_layer(keys[i + 1], hidden_size, hidden_size, ni_hidden)
    params["fc_output"] = init_ei_layer(keys[-1], hidden_size, output_size, ni_out)
    return params


# -----------------------------------------------------------------------------
# Pure-JAX references
# -----------------------------------------------------------------------------
def edensenet_forward_ref(params, x, num_layers=2, mxu_dtype=None):
    """f32 reference; if mxu_dtype is set, matmul inputs are rounded to it
    (mirrors the kernel's bf16-in / f32-accumulate numerics)."""
    def maybe_round(v):
        return v.astype(mxu_dtype).astype(jnp.float32) if mxu_dtype is not None else v

    def layer(p, h):
        w_eff = (p["wex"] - p["wei"] @ p["wix"]).T
        return maybe_round(h) @ maybe_round(w_eff) + p["b"]

    h = x
    for i in range(num_layers + 1):
        h = jnp.maximum(layer(params[f"fc{i}"], h), 0.0)
    return layer(params["fc_output"], h)


# -----------------------------------------------------------------------------
if __name__ == "__main__":
    key = jax.random.PRNGKey(0)
    k_params, k_x = jax.random.split(key)

    batch, input_size, hidden_size, output_size = 8, 32, 32, 10
    num_layers = 2

    params = init_edensenet(k_params, input_size, hidden_size, output_size, num_layers)
    x = jax.random.normal(k_x, (batch, input_size), jnp.float32)

    out = edensenet_forward_pallas(params, x, num_layers)
    out = jax.block_until_ready(out)
    assert out.shape == (batch, output_size)

    # Tight check vs a reference with matching bf16-rounded MXU inputs.
    ref_bf16 = edensenet_forward_ref(params, x, num_layers, mxu_dtype=jnp.bfloat16)
    assert jnp.allclose(out, ref_bf16, atol=1e-3, rtol=1e-3), \
        "Pallas output mismatch vs bf16-rounded reference"

    # Loose check vs the full-precision f32 reference (bf16 MXU inputs).
    ref_f32 = edensenet_forward_ref(params, x, num_layers)
    assert jnp.allclose(out, ref_f32, atol=1e-1, rtol=1e-1), \
        "Pallas output mismatch vs f32 reference"

    print("KERNEL_OK")
</pallas_src>

<mosaic_0001>
module attributes {stable_mosaic.version = 11 : i64} {
  func.func @edensenet_kernel(%arg0: memref<8x128xbf16, #tpu.memory_space<vmem>>, %arg1: memref<128x128xbf16, #tpu.memory_space<vmem>>, %arg2: memref<1x128xf32, #tpu.memory_space<vmem>>, %arg3: memref<128x128xbf16, #tpu.memory_space<vmem>>, %arg4: memref<1x128xf32, #tpu.memory_space<vmem>>, %arg5: memref<128x128xbf16, #tpu.memory_space<vmem>>, %arg6: memref<1x128xf32, #tpu.memory_space<vmem>>, %arg7: memref<128x128xbf16, #tpu.memory_space<vmem>>, %arg8: memref<1x128xf32, #tpu.memory_space<vmem>>, %arg9: memref<8x128xf32, #tpu.memory_space<vmem>>) attributes {dimension_semantics = [], scalar_prefetch = 0 : i64, scratch_operands = 0 : i64, tpu.core_type = #tpu.core_type<tc>} {
    %c0 = arith.constant 0 : index
    %c0_0 = arith.constant 0 : index
    %0 = vector.load %arg0[%c0, %c0_0] : memref<8x128xbf16, #tpu.memory_space<vmem>>, vector<8x128xbf16>
    %c0_1 = arith.constant 0 : index
    %c0_2 = arith.constant 0 : index
    %1 = vector.load %arg1[%c0_1, %c0_2] : memref<128x128xbf16, #tpu.memory_space<vmem>>, vector<128x128xbf16>
    %c0_3 = arith.constant 0 : index
    %c0_4 = arith.constant 0 : index
    %2 = vector.load %arg2[%c0_3, %c0_4] : memref<1x128xf32, #tpu.memory_space<vmem>>, vector<1x128xf32>
    %cst = arith.constant dense<0.000000e+00> : vector<8x128xf32>
    %3 = tpu.matmul %0, %1, %cst {dimension_numbers = #tpu.dot_dimension_numbers<[1], [0], [0], [1], [0, 0, 1, 1], [], []>} : vector<8x128xbf16>, vector<128x128xbf16>, vector<8x128xf32> -> vector<8x128xf32>
    %4 = vector.broadcast %2 : vector<1x128xf32> to vector<8x128xf32>
    %5 = arith.addf %3, %4 : vector<8x128xf32>
    %cst_5 = arith.constant 0.000000e+00 : f32
    %6 = vector.broadcast %cst_5 : f32 to vector<8x128xf32>
    %7 = arith.maximumf %5, %6 : vector<8x128xf32>
    %8 = arith.truncf %7 : vector<8x128xf32> to vector<8x128xbf16>
    %c0_6 = arith.constant 0 : index
    %c0_7 = arith.constant 0 : index
    %9 = vector.load %arg3[%c0_6, %c0_7] : memref<128x128xbf16, #tpu.memory_space<vmem>>, vector<128x128xbf16>
    %c0_8 = arith.constant 0 : index
    %c0_9 = arith.constant 0 : index
    %10 = vector.load %arg4[%c0_8, %c0_9] : memref<1x128xf32, #tpu.memory_space<vmem>>, vector<1x128xf32>
    %cst_10 = arith.constant dense<0.000000e+00> : vector<8x128xf32>
    %11 = tpu.matmul %8, %9, %cst_10 {dimension_numbers = #tpu.dot_dimension_numbers<[1], [0], [0], [1], [0, 0, 1, 1], [], []>} : vector<8x128xbf16>, vector<128x128xbf16>, vector<8x128xf32> -> vector<8x128xf32>
    %12 = vector.broadcast %10 : vector<1x128xf32> to vector<8x128xf32>
    %13 = arith.addf %11, %12 : vector<8x128xf32>
    %cst_11 = arith.constant 0.000000e+00 : f32
    %14 = vector.broadcast %cst_11 : f32 to vector<8x128xf32>
    %15 = arith.maximumf %13, %14 : vector<8x128xf32>
    %16 = arith.truncf %15 : vector<8x128xf32> to vector<8x128xbf16>
    %c0_12 = arith.constant 0 : index
    %c0_13 = arith.constant 0 : index
    %17 = vector.load %arg5[%c0_12, %c0_13] : memref<128x128xbf16, #tpu.memory_space<vmem>>, vector<128x128xbf16>
    %c0_14 = arith.constant 0 : index
    %c0_15 = arith.constant 0 : index
    %18 = vector.load %arg6[%c0_14, %c0_15] : memref<1x128xf32, #tpu.memory_space<vmem>>, vector<1x128xf32>
    %cst_16 = arith.constant dense<0.000000e+00> : vector<8x128xf32>
    %19 = tpu.matmul %16, %17, %cst_16 {dimension_numbers = #tpu.dot_dimension_numbers<[1], [0], [0], [1], [0, 0, 1, 1], [], []>} : vector<8x128xbf16>, vector<128x128xbf16>, vector<8x128xf32> -> vector<8x128xf32>
    %20 = vector.broadcast %18 : vector<1x128xf32> to vector<8x128xf32>
    %21 = arith.addf %19, %20 : vector<8x128xf32>
    %cst_17 = arith.constant 0.000000e+00 : f32
    %22 = vector.broadcast %cst_17 : f32 to vector<8x128xf32>
    %23 = arith.maximumf %21, %22 : vector<8x128xf32>
    %24 = arith.truncf %23 : vector<8x128xf32> to vector<8x128xbf16>
    %c0_18 = arith.constant 0 : index
    %c0_19 = arith.constant 0 : index
    %25 = vector.load %arg7[%c0_18, %c0_19] : memref<128x128xbf16, #tpu.memory_space<vmem>>, vector<128x128xbf16>
    %c0_20 = arith.constant 0 : index
    %c0_21 = arith.constant 0 : index
    %26 = vector.load %arg8[%c0_20, %c0_21] : memref<1x128xf32, #tpu.memory_space<vmem>>, vector<1x128xf32>
    %cst_22 = arith.constant dense<0.000000e+00> : vector<8x128xf32>
    %27 = tpu.matmul %24, %25, %cst_22 {dimension_numbers = #tpu.dot_dimension_numbers<[1], [0], [0], [1], [0, 0, 1, 1], [], []>} : vector<8x128xbf16>, vector<128x128xbf16>, vector<8x128xf32> -> vector<8x128xf32>
    %28 = vector.broadcast %26 : vector<1x128xf32> to vector<8x128xf32>
    %29 = arith.addf %27, %28 : vector<8x128xf32>
    %c0_23 = arith.constant 0 : index
    %c0_24 = arith.constant 0 : index
    %30 = vector.load %arg9[%c0_23, %c0_24] : memref<8x128xf32, #tpu.memory_space<vmem>>, vector<8x128xf32>
    tpu.vector_store %arg9[%c0_23, %c0_24], %29 {strides = array<i32>} : memref<8x128xf32, #tpu.memory_space<vmem>>, vector<8x128xf32>,
    return
  }
}

</mosaic_0001>

<bundles_post_ra>
// kernel: tpu_custom_call.1
= control target key start
LH: loop header
LB: loop body
LE: loop exit
PB: predicated region body
PF: predicated region fallthrough
CT: control target
= control target key end

     0   :  { %14 = vsyncpa [#allocation3], 0  ;;  %s1033_s0 = inlined_call_operand.hbm [shape: bf16[8,128], index: 0, kind: input, shape index: {}]   ;;  %s1034_s1 = inlined_call_operand.hbm [shape: bf16[128,128], index: 1, kind: input, shape index: {}]   ;;  %s1035_s2 = inlined_call_operand.vmem [shape: f32[1,128], index: 2, kind: input, shape index: {}]   ;;  %s1036_s3 = inlined_call_operand.hbm [shape: bf16[128,128], index: 3, kind: input, shape index: {}]   ;;  %s1037_s4 = inlined_call_operand.vmem [shape: f32[1,128], index: 4, kind: input, shape index: {}]   ;;  %s1038_s5 = inlined_call_operand.hbm [shape: bf16[128,128], index: 5, kind: input, shape index: {}]   ;;  %s1039_s6 = inlined_call_operand.vmem [shape: f32[1,128], index: 6, kind: input, shape index: {}]   ;;  %s1040_s7 = inlined_call_operand.hbm [shape: bf16[128,128], index: 7, kind: input, shape index: {}]   ;;  %s1041_s8 = inlined_call_operand.vmem [shape: f32[1,128], index: 8, kind: input, shape index: {}]   ;;  %s1042_s9 = inlined_call_operand.hbm [shape: f32[8,128], index: 9, kind: output, shape index: {}]  }
   0x1   :  { %15 = vsyncpa [#allocation6], 0 }
   0x2   :  { %16 = vsyncpa [#allocation9], 0 }
   0x3   :  { %17 = vsyncpa [#allocation4], 0  ;;  %s891_s30 = smov [#allocation5]  }
   0x4   :  { %s33_s10 = sshll.u32 %s891_s30, 4  ;;  %s34_s10 = int_to_ptr.vmem [resolvable:$true] %s33_s10 }
   0x5   :  { %s771_s11 = scalar_lea.vmem %s34_s10, 1024  ;;  %p776_p1 = scmp.lt.s32.totalorder %s34_s10, %s34_s10 }
   0x6   :  { %p772_p0 = scmp.ne.s32.totalorder %s34_s10, %s771_s11  ;;  %p777_p2 = scmp.lt.s32.totalorder %s771_s11, %s771_s11 }
   0x8   :  { %p778_p3 = por %p777_p2, %p776_p1 }
   0xa   :  { %p779_p4 = pnand %p778_p3, %p772_p0 }
   0xc   :  { %782 = shalt.err (!%p779_p4)
}
   0xd   :  { %s892_s12 = smov 64   ;;  %s893_s13 = smov 4  }
   0xe   :  { %39 = dma.hbm_to_vmem [thread:$0]  %s1034_s1, 1024, %s34_s10, [#allocation6], %s892_s12, %s892_s12, %s893_s13  }
   0xf   :  { %s894_s16 = smov [#allocation8]   ;;  %s895_s18 = smov [#allocation2]  }
  0x10   :  { %s61_s17 = sshll.u32 %s894_s16, 4  ;;  %s24_s19 = sshll.u32 %s895_s18, 4  ;;  %s62_s17 = int_to_ptr.vmem [resolvable:$true] %s61_s17  ;;  %s25_s19 = int_to_ptr.vmem [resolvable:$true] %s24_s19 }
  0x11   :  { %s791_s20 = scalar_lea.vmem %s62_s17, 1024  ;;  %p796_p6 = scmp.lt.s32.totalorder %s62_s17, %s62_s17 }
  0x12   :  { %p792_p5 = scmp.ne.s32.totalorder %s62_s17, %s791_s20  ;;  %p797_p7 = scmp.lt.s32.totalorder %s791_s20, %s791_s20 }
  0x14   :  { %p798_p8 = por %p797_p7, %p796_p6 }
  0x16   :  { %p799_p9 = pnand %p798_p8, %p792_p5 }
  0x18   :  { %802 = shalt.err (!%p799_p9)
}
  0x19   :  { %67 = dma.hbm_to_vmem [thread:$0]  %s1038_s5, 1024, %s62_s17, [#allocation9], %s892_s12, %s892_s12, %s893_s13  }
  0x1a   :  { %s811_s1 = scalar_lea.vmem %s25_s19, 64  ;;  %p816_p11 = scmp.lt.s32.totalorder %s25_s19, %s25_s19 }
  0x1b   :  { %p812_p10 = scmp.ne.s32.totalorder %s25_s19, %s811_s1  ;;  %p817_p12 = scmp.lt.s32.totalorder %s811_s1, %s811_s1 }
  0x1d   :  { %p818_p13 = por %p817_p12, %p816_p11 }
  0x1f   :  { %p819_p0 = pnand %p818_p13, %p812_p10 }
  0x21   :  { %822 = shalt.err (!%p819_p0)
}
  0x22   :  { %27 = dma.hbm_to_vmem [thread:$0]  %s1033_s0, 64, %s25_s19, [#allocation3]  }
  0x23   :  { %s896_s25 = smov [#allocation7]   ;;  %s897_s27 = smov [#allocation10]  }
  0x24   :  { %s47_s26 = sshll.u32 %s896_s25, 4  ;;  %s75_s28 = sshll.u32 %s897_s27, 4  ;;  %s48_s26 = int_to_ptr.vmem [resolvable:$true] %s47_s26  ;;  %s76_s28 = int_to_ptr.vmem [resolvable:$true] %s75_s28 }
  0x25   :  { %s831_s29 = scalar_lea.vmem %s48_s26, 1024  ;;  %p836_p2 = scmp.lt.s32.totalorder %s48_s26, %s48_s26 }
  0x26   :  { %p832_p1 = scmp.ne.s32.totalorder %s48_s26, %s831_s29  ;;  %p837_p3 = scmp.lt.s32.totalorder %s831_s29, %s831_s29 }
  0x28   :  { %p838_p4 = por %p837_p3, %p836_p2 }
  0x2a   :  { %p839_p5 = pnand %p838_p4, %p832_p1 }
  0x2c   :  { %842 = shalt.err (!%p839_p5)
}
  0x2d   :  { %53 = dma.hbm_to_vmem [thread:$0]  %s1036_s3, 1024, %s48_s26, [#allocation6], %s892_s12, %s892_s12, %s893_s13  }
  0x2e   :  { %s851_s0 = scalar_lea.vmem %s76_s28, 1024  ;;  %p856_p7 = scmp.lt.s32.totalorder %s76_s28, %s76_s28 }
  0x2f   :  { %p852_p6 = scmp.ne.s32.totalorder %s76_s28, %s851_s0  ;;  %p857_p8 = scmp.lt.s32.totalorder %s851_s0, %s851_s0 }
  0x31   :  { %p858_p9 = por %p857_p8, %p856_p7 }
  0x33   :  { %p859_p10 = pnand %p858_p9, %p852_p6 }
  0x35   :  { %862 = shalt.err (!%p859_p10)
}
  0x36   :  { %81 = dma.hbm_to_vmem [thread:$0]  %s1040_s7, 1024, %s76_s28, [#allocation9], %s892_s12, %s892_s12, %s893_s13  }
  0x37   :  { %883 = dma.done.wait [#allocation3], 64  }
  0x38   :  { %884 = vsyncadd [#allocation3], 4294967232 }
  0x39   :  { %885 = dma.done.wait [#allocation6], 2048  }
  0x3a   :  { %886 = vsyncadd [#allocation6], 4294965248 }
  0x3b   :  { %887 = dma.done.wait [#allocation9], 2048  }
  0x3c   :  { %888 = vsyncadd [#allocation9], 4294965248  ;;  %v898_v0 = vmov 0.0   ;;  %vm899_vm0 = vmmov 0   ;;  %v731_v1 = vld [vmem:[#allocation5 + $0x38] sm:$0xff]   ;;  %v732_v2 = vld [vmem:[#allocation5 + $0x30] sm:$0xff]  }
  0x3d   :  { %641 = vmatprep.subr.bf16.mxu0 %v898_v0  ;;  %657 = vmatprep.mubr.msk.bf16.mxu0 %vm899_vm0, %v898_v0  ;;  %v733_v3 = vld [vmem:[#allocation5 + $0x28] sm:$0xff]   ;;  %v739_v4 = vld [vmem:[#allocation7 + $0x38] sm:$0xff]   ;;  %v734_v5 = vld [vmem:[#allocation5 + $0x20] sm:$0xff]   ;;  %s900_s16 = smov [#allocation11]  }
  0x3e   :  { %661 = vmatprep.subr.bf16.mxu1 %v898_v0  ;;  %677 = vmatprep.mubr.msk.bf16.mxu1 %vm899_vm0, %v898_v0  ;;  %v740_v6 = vld [vmem:[#allocation7 + $0x30] sm:$0xff]   ;;  %v735_v7 = vld [vmem:[#allocation5 + $0x18] sm:$0xff]   ;;  %v741_v8 = vld [vmem:[#allocation7 + $0x28] sm:$0xff]   ;;  %s558_s17 = sshll.u32 %s900_s16, 4  ;;  %s559_s17 = int_to_ptr.vmem [resolvable:$true] %s558_s17 }
  0x3f   :  { %642 = vmatpush3.bf16.msra.mxu0 %v731_v1  ;;  %662 = vmatpush3.bf16.msra.mxu1 %v739_v4  ;;  %v736_v9 = vld [vmem:[#allocation5 + $0x10] sm:$0xff]   ;;  %v742_v10 = vld [vmem:[#allocation7 + $0x20] sm:$0xff]   ;;  %v737_v11 = vld [vmem:[#allocation5 + $0x8] sm:$0xff]   ;;  %p868_p12 = scmp.lt.s32.totalorder %s559_s17, %s559_s17 }
  0x40   :  { %643 = vmatprep.subr.bf16.mxu0 %v898_v0  ;;  %663 = vmatprep.subr.bf16.mxu1 %v898_v0  ;;  %v743_v12 = vld [vmem:[#allocation7 + $0x18] sm:$0xff]   ;;  %v738_v13 = vld [vmem:[#allocation5] sm:$0xff]   ;;  %v744_v14 = vld [vmem:[#allocation7 + $0x10] sm:$0xff]  }
  0x41   :  { %v100_v15 = vld [vmem:[#allocation2] sm:$0xf]  ;;  %v745_v16 = vld [vmem:[#allocation7 + $0x8] sm:$0xff]   ;;  %v746_v17 = vld [vmem:[#allocation7] sm:$0xff]  }
  0x42   :  { %v747_v18 = vld [vmem:[#allocation8 + $0x38] sm:$0xff]   ;;  %v748_v19 = vld [vmem:[#allocation8 + $0x30] sm:$0xff]   ;;  %v749_v20 = vld [vmem:[#allocation8 + $0x28] sm:$0xff]  }
  0x43   :  { %644 = vmatpush3.bf16.msra.mxu0 %v732_v2  ;;  %664 = vmatpush3.bf16.msra.mxu1 %v740_v6  ;;  %v750_v21 = vld [vmem:[#allocation8 + $0x20] sm:$0xff]   ;;  %v751_v22 = vld [vmem:[#allocation8 + $0x18] sm:$0xff]   ;;  %v752_v23 = vld [vmem:[#allocation8 + $0x10] sm:$0xff]  }
  0x44   :  { %645 = vmatprep.subr.bf16.mxu0 %v898_v0  ;;  %665 = vmatprep.subr.bf16.mxu1 %v898_v0  ;;  %v569_v24 = vld [vmem:[%s1035_s2] ss:$0 sm:$0xff]  ;;  %v753_v32 = vld [vmem:[#allocation8 + $0x8] sm:$0xff]   ;;  %v754_v33 = vld [vmem:[#allocation8] sm:$0xff]  }
  0x45   :  { %v755_v34 = vld [vmem:[#allocation10 + $0x38] sm:$0xff]   ;;  %v756_v35 = vld [vmem:[#allocation10 + $0x30] sm:$0xff]   ;;  %v757_v36 = vld [vmem:[#allocation10 + $0x28] sm:$0xff]  }
  0x46   :  { %v758_v37 = vld [vmem:[#allocation10 + $0x20] sm:$0xff]   ;;  %v759_v38 = vld [vmem:[#allocation10 + $0x18] sm:$0xff]   ;;  %v760_v39 = vld [vmem:[#allocation10 + $0x10] sm:$0xff]  }
  0x47   :  { %646 = vmatpush3.bf16.msra.mxu0 %v733_v3  ;;  %666 = vmatpush3.bf16.msra.mxu1 %v741_v8  ;;  %v578_v40 = vld [vmem:[%s1037_s4] ss:$0 sm:$0xff]  ;;  %v761_v48 = vld [vmem:[#allocation10 + $0x8] sm:$0xff]   ;;  %v762_v49 = vld [vmem:[#allocation10] sm:$0xff]  }
  0x48   :  { %647 = vmatprep.subr.bf16.mxu0 %v898_v0  ;;  %667 = vmatprep.subr.bf16.mxu1 %v898_v0  ;;  %v587_v50 = vld [vmem:[%s1039_s6] ss:$0 sm:$0xff]  ;;  %s863_s6 = scalar_lea.vmem %s559_s17, 128 }
  0x49   :  { %v596_v58 = vld [vmem:[%s1041_s8] ss:$0 sm:$0xff]  ;;  %p864_p11 = scmp.ne.s32.totalorder %s559_s17, %s863_s6  ;;  %p869_p13 = scmp.lt.s32.totalorder %s863_s6, %s863_s6 }
  0x4b   :  { %648 = vmatpush3.bf16.msra.mxu0 %v734_v5  ;;  %668 = vmatpush3.bf16.msra.mxu1 %v742_v10  ;;  %p870_p0 = por %p869_p13, %p868_p12 }
  0x4c   :  { %649 = vmatprep.subr.bf16.mxu0 %v898_v0  ;;  %669 = vmatprep.subr.bf16.mxu1 %v898_v0 }
  0x4d   :  { %p871_p1 = pnand %p870_p0, %p864_p11 }
  0x4f   :  { %650 = vmatpush3.bf16.msra.mxu0 %v735_v7  ;;  %670 = vmatpush3.bf16.msra.mxu1 %v743_v12 }
  0x50   :  { %651 = vmatprep.subr.bf16.mxu0 %v898_v0  ;;  %671 = vmatprep.subr.bf16.mxu1 %v898_v0 }
  0x53   :  { %652 = vmatpush3.bf16.msra.mxu0 %v736_v9  ;;  %672 = vmatpush3.bf16.msra.mxu1 %v744_v14 }
  0x54   :  { %653 = vmatprep.subr.bf16.mxu0 %v898_v0  ;;  %673 = vmatprep.subr.bf16.mxu1 %v898_v0 }
  0x57   :  { %654 = vmatpush3.bf16.msra.mxu0 %v737_v11  ;;  %674 = vmatpush3.bf16.msra.mxu1 %v745_v16 }
  0x58   :  { %655 = vmatprep.subr.bf16.mxu0 %v898_v0  ;;  %675 = vmatprep.subr.bf16.mxu1 %v898_v0 }
  0x5b   :  { %656 = vmatpush3.bf16.msra.mxu0 %v738_v13  ;;  %676 = vmatpush3.bf16.msra.mxu1 %v746_v17 }
  0x5c   :  { %681 = vmatprep.subr.bf16.mxu0 %v898_v0  ;;  %701 = vmatprep.subr.bf16.mxu1 %v898_v0 }
  0x5e   :  { %658 = vmatmul.mubr.bf16.vlgmr.msra.gmra.mxu0 %v100_v15 }
  0x5f   :  { %697 = vmatprep.mubr.msk.bf16.mxu0 %vm899_vm0, %v898_v0  ;;  %682 = vmatpush3.bf16.msra.mxu0 %v747_v18 }
  0x60   :  { %683 = vmatprep.subr.bf16.mxu0 %v898_v0 }
  0x63   :  { %684 = vmatpush3.bf16.msra.mxu0 %v748_v19 }
  0x64   :  { %685 = vmatprep.subr.bf16.mxu0 %v898_v0 }
  0x67   :  { %686 = vmatpush3.bf16.msra.mxu0 %v749_v20 }
  0x68   :  { %687 = vmatprep.subr.bf16.mxu0 %v898_v0 }
  0x6b   :  { %688 = vmatpush3.bf16.msra.mxu0 %v750_v21 }
  0x6c   :  { %689 = vmatprep.subr.bf16.mxu0 %v898_v0 }
  0x6f   :  { %690 = vmatpush3.bf16.msra.mxu0 %v751_v22 }
  0x70   :  { %691 = vmatprep.subr.bf16.mxu0 %v898_v0 }
  0x73   :  { %692 = vmatpush3.bf16.msra.mxu0 %v752_v23 }
  0x74   :  { %693 = vmatprep.subr.bf16.mxu0 %v898_v0 }
  0x77   :  { %694 = vmatpush3.bf16.msra.mxu0 %v753_v32 }
  0x78   :  { %695 = vmatprep.subr.bf16.mxu0 %v898_v0 }
  0x7b   :  { %696 = vmatpush3.bf16.msra.mxu0 %v754_v33 }
 0x11e   :  { %v206_v25 = vpop.f32.mrf.mxu0 }
 0x11f   :  { %v207_v26 = vadd.f32 %v569_v24, %v206_v25 }
 0x120   :  { %v659_v27 = vpop.f32.mrf.mxu0 }
 0x121   :  { %v212_v28 = vmax.f32 %v207_v26, 0.0 }
 0x122   :  { %v209_v29 = vpop.f32.mrf.mxu0 }
 0x123   :  { %v213_v30 = vpack.c.bf16 %v212_v28, %v212_v28 }
 0x124   :  { %v660_v31 = vpop.f32.mrf.mxu0 }
 0x125   :  { %678 = vmatmul.mubr.bf16.vlgmr.msra.gmra.mxu1 %v213_v30 }
 0x126   :  { %717 = vmatprep.mubr.msk.bf16.mxu1 %vm899_vm0, %v898_v0  ;;  %702 = vmatpush3.bf16.msra.mxu1 %v755_v34 }
 0x127   :  { %703 = vmatprep.subr.bf16.mxu1 %v898_v0 }
 0x12a   :  { %704 = vmatpush3.bf16.msra.mxu1 %v756_v35 }
 0x12b   :  { %705 = vmatprep.subr.bf16.mxu1 %v898_v0 }
 0x12e   :  { %706 = vmatpush3.bf16.msra.mxu1 %v757_v36 }
 0x12f   :  { %707 = vmatprep.subr.bf16.mxu1 %v898_v0 }
 0x132   :  { %708 = vmatpush3.bf16.msra.mxu1 %v758_v37 }
 0x133   :  { %709 = vmatprep.subr.bf16.mxu1 %v898_v0 }
 0x136   :  { %710 = vmatpush3.bf16.msra.mxu1 %v759_v38 }
 0x137   :  { %711 = vmatprep.subr.bf16.mxu1 %v898_v0 }
 0x13a   :  { %712 = vmatpush3.bf16.msra.mxu1 %v760_v39 }
 0x13b   :  { %713 = vmatprep.subr.bf16.mxu1 %v898_v0 }
 0x13e   :  { %714 = vmatpush3.bf16.msra.mxu1 %v761_v48 }
 0x13f   :  { %715 = vmatprep.subr.bf16.mxu1 %v898_v0 }
 0x142   :  { %716 = vmatpush3.bf16.msra.mxu1 %v762_v49 }
 0x1e5   :  { %v319_v41 = vpop.f32.mrf.mxu1 }
 0x1e6   :  { %v320_v42 = vadd.f32 %v578_v40, %v319_v41 }
 0x1e7   :  { %v679_v43 = vpop.f32.mrf.mxu1 }
 0x1e8   :  { %v325_v44 = vmax.f32 %v320_v42, 0.0 }
 0x1e9   :  { %v322_v45 = vpop.f32.mrf.mxu1 }
 0x1ea   :  { %v326_v46 = vpack.c.bf16 %v325_v44, %v325_v44 }
 0x1eb   :  { %v680_v47 = vpop.f32.mrf.mxu1 }
 0x1ec   :  { %698 = vmatmul.mubr.bf16.vlgmr.msra.gmra.mxu0 %v326_v46 }
 0x2ac   :  { %v432_v51 = vpop.f32.mrf.mxu0 }
 0x2ad   :  { %v433_v52 = vadd.f32 %v587_v50, %v432_v51 }
 0x2ae   :  { %v699_v53 = vpop.f32.mrf.mxu0 }
 0x2af   :  { %v438_v54 = vmax.f32 %v433_v52, 0.0 }
 0x2b0   :  { %v435_v55 = vpop.f32.mrf.mxu0 }
 0x2b1   :  { %v439_v56 = vpack.c.bf16 %v438_v54, %v438_v54 }
 0x2b2   :  { %v700_v57 = vpop.f32.mrf.mxu0 }
 0x2b3   :  { %718 = vmatmul.mubr.bf16.vlgmr.msra.gmra.mxu1 %v439_v56 }
 0x373   :  { %v545_v59 = vpop.f32.mrf.mxu1 }
 0x374   :  { %v546_v60 = vadd.f32 %v596_v58, %v545_v59 }
 0x375   :  { %v719_v61 = vpop.f32.mrf.mxu1 }
 0x376   :  { %551 = vst [vmem:[#allocation11] sm:$0xff] %v546_v60 }
 0x377   :  { %v548_v62 = vpop.f32.mrf.mxu1 }
 0x378   :  { %874 = shalt.err (!%p871_p1)
}
 0x379   :  { %561 = dma.vmem_to_hbm [thread:$0]  %s559_s17, 128, %s1042_s9, [#allocation4]   ;;  %v720_v63 = vpop.f32.mrf.mxu1 }
 0x37a   :  { %889 = dma.done.wait [#allocation4], 128  }
 0x37b   :  { %890 = vsyncadd [#allocation4], 4294967168 }
 0x37c   :  { %565 = vsyncpa [#allocation3], 1 }
 0x37d   :  { %566 = vsyncpa [#allocation6], 1 }
 0x37e   :  { %567 = vsyncpa [#allocation9], 1 }
 0x37f   :  { %568 = vsyncpa [#allocation4], 1 }

</bundles_post_ra>
